<compile_context>
chip_gen: v7x
topology: tpu7x:2x2x1
jax: 0.10.0
libtpu: 0.0.40
codegen_flags: <defaults>
</compile_context>

<pallas_src>
import functools

import jax
import jax.numpy as jnp
import numpy as np
from jax.experimental import pallas as pl
from jax.experimental.pallas import tpu as pltpu


# ----------------------------- pass 1: conv + BN partial stats -----------------------------
def _conv_stats_kernel(x_ref, w_ref, b_ref, y_ref, stats_ref, *, L, C):
    """One batch row per grid step.

    x_ref     : (1, L, C)     unpadded input tile (channels-last)
    w_ref     : (3C, C)       conv taps stacked on the contraction axis (tap-major)
    b_ref     : (1, C)        conv bias
    y_ref     : (1, Lc, C)    conv output (pre-BN), Lc = L + 2
    stats_ref : (1, 2, C)     per-tile [sum, sum-of-squares] over the Lc positions
    """
    Lc = L + 2
    x = x_ref[0]                                                    # (L, C), f32

    # circular padding=2 built in-kernel: the three k-shifted views of the padded signal.
    x0 = jnp.concatenate([x[L - 2:, :], x], axis=0)                 # positions -2 .. L-1
    x1 = jnp.concatenate([x[L - 1:, :], x, x[:1, :]], axis=0)       # positions -1 .. L
    x2 = jnp.concatenate([x, x[:2, :]], axis=0)                     # positions  0 .. L+1
    xc = jnp.concatenate([x0, x1, x2], axis=1)                      # (Lc, 3C)

    # single MXU matmul: (Lc, 3C) @ (3C, C)
    y = jnp.dot(xc, w_ref[...], preferred_element_type=jnp.float32) + b_ref[...]
    y_ref[0] = y

    # BN partial statistics for this tile (reduced across tiles in the wrapper).
    s = jnp.sum(y, axis=0, keepdims=True)                           # (1, C)
    sq = jnp.sum(y * y, axis=0, keepdims=True)                      # (1, C)
    stats_ref[0] = jnp.concatenate([s, sq], axis=0)                 # (2, C)


# ----------------------------- pass 2: BN affine + ELU + maxpool ----------------------------
def _bn_elu_pool_kernel(y_ref, scale_ref, shift_ref, o_ref, yp_scr, *, Lc, Lout, C):
    """One batch row per grid step.

    y_ref     : (1, Lc, C)    conv output
    scale_ref : (1, C)        gamma * rsqrt(var + eps)
    shift_ref : (1, C)        beta - mean * scale
    o_ref     : (1, Lout, C)  pooled output
    yp_scr    : (Lc + 2, C)   VMEM scratch: ELU output padded by one row on each side
    """
    y = y_ref[0] * scale_ref[...] + shift_ref[...]                  # BN affine (global stats)
    y = jnp.where(y > 0, y, jnp.exp(jnp.minimum(y, 0.0)) - 1.0)     # ELU(alpha=1), output > -1

    # MaxPool1d(k=3, s=2, p=1).  ELU output is strictly > -1, so a -2.0 pad acts as -inf.
    neg = jnp.full((1, C), -2.0, jnp.float32)
    yp_scr[pl.ds(0, 1), :] = neg
    yp_scr[pl.ds(1, Lc), :] = y
    yp_scr[pl.ds(Lc + 1, 1), :] = neg

    # stride-2 window max via sublane-strided loads: out[j] = max(yp[2j], yp[2j+1], yp[2j+2]).
    e0 = yp_scr[pl.ds(0, Lout, stride=2), :]
    e1 = yp_scr[pl.ds(1, Lout, stride=2), :]
    e2 = yp_scr[pl.ds(2, Lout, stride=2), :]
    o_ref[0] = jnp.maximum(jnp.maximum(e0, e1), e2).astype(o_ref.dtype)


# --------------------------------------- wrapper ---------------------------------------------
def conv_layer_forward(x, conv_w, conv_b, bn_gamma, bn_beta):
    """x: (B, L, C) channels-last.  conv_w: (Cout, Cin, K=3) torch layout."""
    x = x.astype(jnp.float32)
    B, L, C = x.shape
    K = 3
    Lc = L + 2                          # circular conv output length (padding=2, k=3)
    Lout = (Lc - 1) // 2 + 1            # maxpool(k=3, s=2, p=1)
    nB = B                              # one batch row per tile (tile size is a tuning knob)

    # conv taps reorganized so the concatenated-tap matmul works:
    # W[k*C + i, o] = conv_w[o, i, k]
    w = jnp.transpose(conv_w.astype(jnp.float32), (2, 1, 0)).reshape(K * C, C)
    b2 = conv_b.reshape(1, C).astype(jnp.float32)

    vmem_limit = 32 * 1024 * 1024

    # ---- pass 1: conv + per-tile BN partials ----
    flops1 = int(2 * B * Lc * (K * C) * C)
    bytes1 = int(4 * (B * L * C + K * C * C + C + B * Lc * C + nB * 2 * C))
    y, stats = pl.pallas_call(
        functools.partial(_conv_stats_kernel, L=L, C=C),
        grid=(nB,),
        in_specs=[
            pl.BlockSpec((1, L, C), lambda i: (i, 0, 0)),
            pl.BlockSpec((K * C, C), lambda i: (0, 0)),
            pl.BlockSpec((1, C), lambda i: (0, 0)),
        ],
        out_specs=(
            pl.BlockSpec((1, Lc, C), lambda i: (i, 0, 0)),
            pl.BlockSpec((1, 2, C), lambda i: (i, 0, 0)),
        ),
        out_shape=(
            jax.ShapeDtypeStruct((B, Lc, C), jnp.float32),
            jax.ShapeDtypeStruct((nB, 2, C), jnp.float32),
        ),
        compiler_params=pltpu.CompilerParams(
            dimension_semantics=("parallel",), vmem_limit_bytes=vmem_limit),
        cost_estimate=pl.CostEstimate(
            flops=flops1, transcendentals=0, bytes_accessed=bytes1),
    )(x, w, b2)

    # ---- finalize BN batch statistics (tiny per-channel math; biased var, eps=1e-5) ----
    n = float(B * Lc)
    tot = jnp.sum(stats, axis=0)                                   # (2, C)
    mean = tot[0] / n
    var = jnp.maximum(tot[1] / n - mean * mean, 0.0)
    scale = bn_gamma.astype(jnp.float32) * jax.lax.rsqrt(var + 1e-5)
    shift = bn_beta.astype(jnp.float32) - mean * scale
    scale2 = scale.reshape(1, C)
    shift2 = shift.reshape(1, C)

    # ---- pass 2: BN affine + ELU + maxpool ----
    flops2 = int(10 * B * Lc * C)
    bytes2 = int(4 * (B * Lc * C + 2 * C + B * Lout * C))
    out = pl.pallas_call(
        functools.partial(_bn_elu_pool_kernel, Lc=Lc, Lout=Lout, C=C),
        grid=(nB,),
        in_specs=[
            pl.BlockSpec((1, Lc, C), lambda i: (i, 0, 0)),
            pl.BlockSpec((1, C), lambda i: (0, 0)),
            pl.BlockSpec((1, C), lambda i: (0, 0)),
        ],
        out_specs=pl.BlockSpec((1, Lout, C), lambda i: (i, 0, 0)),
        out_shape=jax.ShapeDtypeStruct((B, Lout, C), jnp.float32),
        scratch_shapes=[pltpu.VMEM((Lc + 2, C), jnp.float32)],
        compiler_params=pltpu.CompilerParams(
            dimension_semantics=("parallel",), vmem_limit_bytes=vmem_limit),
        cost_estimate=pl.CostEstimate(
            flops=flops2, transcendentals=int(B * Lc * C), bytes_accessed=bytes2),
    )(y, scale2, shift2)
    return out


# --------------------------------------- reference -------------------------------------------
def _reference(x, conv_w, conv_b, bn_gamma, bn_beta):
    """Pure-JAX reference mirroring the PyTorch forward (training-mode BN)."""
    x = x.astype(jnp.float32)
    B, L, C = x.shape
    xp = jnp.concatenate([x[:, -2:, :], x, x[:, :2, :]], axis=1)
    Lc = L + 2
    y = jnp.zeros((B, Lc, C), jnp.float32)
    for k in range(3):
        y = y + jnp.einsum('blc,co->blo', xp[:, k:k + Lc, :], conv_w[:, :, k].T)
    y = y + conv_b[None, None, :]
    mean = jnp.mean(y, axis=(0, 1), keepdims=True)
    var = jnp.mean((y - mean) ** 2, axis=(0, 1), keepdims=True)
    y = (y - mean) / jnp.sqrt(var + 1e-5) * bn_gamma[None, None, :] + bn_beta[None, None, :]
    y = jnp.where(y > 0, y, jnp.exp(jnp.minimum(y, 0.0)) - 1.0)
    yp = jnp.pad(y, ((0, 0), (1, 1), (0, 0)), constant_values=-jnp.inf)
    Lout = (Lc - 1) // 2 + 1
    cols = [jnp.max(yp[:, 2 * j:2 * j + 3, :], axis=1) for j in range(Lout)]
    return jnp.stack(cols, axis=1)


if __name__ == "__main__":
    B, L, C = 2, 8, 4   # batch, sequence length, c_in

    key = jax.random.PRNGKey(0)
    kx, kw, kb, kg, kbe = jax.random.split(key, 5)
    x = jax.random.normal(kx, (B, L, C), jnp.float32)
    conv_w = 0.3 * jax.random.normal(kw, (C, C, 3), jnp.float32)   # (Cout, Cin, K) torch layout
    conv_b = 0.1 * jax.random.normal(kb, (C,), jnp.float32)
    bn_gamma = 1.0 + 0.1 * jax.random.normal(kg, (C,), jnp.float32)
    bn_beta = 0.1 * jax.random.normal(kbe, (C,), jnp.float32)

    out = conv_layer_forward(x, conv_w, conv_b, bn_gamma, bn_beta)
    out = jax.block_until_ready(out)

    ref = jax.block_until_ready(_reference(x, conv_w, conv_b, bn_gamma, bn_beta))
    np.testing.assert_allclose(np.asarray(out), np.asarray(ref), rtol=1e-3, atol=1e-4)

    print("KERNEL_OK")
</pallas_src>

<mosaic_0001>
module attributes {stable_mosaic.version = 11 : i64} {
  func.func @_conv_stats_kernel(%arg0: i32, %arg1: memref<1x8x4xf32, #tpu.memory_space<vmem>>, %arg2: memref<12x4xf32, #tpu.memory_space<vmem>>, %arg3: memref<1x4xf32, #tpu.memory_space<vmem>>, %arg4: memref<1x10x4xf32, #tpu.memory_space<vmem>>, %arg5: memref<1x2x4xf32, #tpu.memory_space<vmem>>) attributes {dimension_semantics = [#tpu.dimension_semantics<parallel>], iteration_bounds = array<i64: 2>, scalar_prefetch = 0 : i64, scratch_operands = 0 : i64, tpu.core_type = #tpu.core_type<tc>, window_params = [{transform_indices = @transform_0, window_bounds = array<i64: 1, 8, 4>}, {pipeline_mode = #tpu.pipeline_mode<synchronous>, transform_indices = @transform_1, window_bounds = array<i64: 12, 4>}, {pipeline_mode = #tpu.pipeline_mode<synchronous>, transform_indices = @transform_2, window_bounds = array<i64: 1, 4>}, {transform_indices = @transform_3, window_bounds = array<i64: 1, 10, 4>}, {transform_indices = @transform_4, window_bounds = array<i64: 1, 2, 4>}]} {
    %c0 = arith.constant 0 : index
    %c0_0 = arith.constant 0 : index
    %c0_1 = arith.constant 0 : index
    %0 = vector.load %arg1[%c0, %c0_0, %c0_1] : memref<1x8x4xf32, #tpu.memory_space<vmem>>, vector<1x8x4xf32>
    %1 = vector.shape_cast %0 : vector<1x8x4xf32> to vector<8x4xf32>
    %2 = vector.extract_strided_slice %1 {offsets = [6, 0], sizes = [2, 4], strides = [1, 1]} : vector<8x4xf32> to vector<2x4xf32>
    %3 = tpu.concatenate %2, %1 in 0 : vector<2x4xf32>, vector<8x4xf32> -> vector<10x4xf32>
    %4 = vector.extract_strided_slice %1 {offsets = [7, 0], sizes = [1, 4], strides = [1, 1]} : vector<8x4xf32> to vector<1x4xf32>
    %5 = vector.extract_strided_slice %1 {offsets = [0, 0], sizes = [1, 4], strides = [1, 1]} : vector<8x4xf32> to vector<1x4xf32>
    %6 = tpu.concatenate %4, %1, %5 in 0 : vector<1x4xf32>, vector<8x4xf32>, vector<1x4xf32> -> vector<10x4xf32>
    %7 = vector.extract_strided_slice %1 {offsets = [0, 0], sizes = [2, 4], strides = [1, 1]} : vector<8x4xf32> to vector<2x4xf32>
    %8 = tpu.concatenate %1, %7 in 0 : vector<8x4xf32>, vector<2x4xf32> -> vector<10x4xf32>
    %9 = tpu.concatenate %3, %6, %8 in 1 : vector<10x4xf32>, vector<10x4xf32>, vector<10x4xf32> -> vector<10x12xf32>
    %c0_2 = arith.constant 0 : index
    %c0_3 = arith.constant 0 : index
    %10 = vector.load %arg2[%c0_2, %c0_3] : memref<12x4xf32, #tpu.memory_space<vmem>>, vector<12x4xf32>
    %cst = arith.constant dense<0.000000e+00> : vector<10x4xf32>
    %11 = tpu.matmul %9, %10, %cst {dimension_numbers = #tpu.dot_dimension_numbers<[1], [0], [0], [1], [0, 0, 1, 1], [], []>} : vector<10x12xf32>, vector<12x4xf32>, vector<10x4xf32> -> vector<10x4xf32>
    %c0_4 = arith.constant 0 : index
    %c0_5 = arith.constant 0 : index
    %12 = vector.load %arg3[%c0_4, %c0_5] : memref<1x4xf32, #tpu.memory_space<vmem>>, vector<1x4xf32>
    %13 = vector.broadcast %12 : vector<1x4xf32> to vector<10x4xf32>
    %14 = arith.addf %11, %13 : vector<10x4xf32>
    %c0_6 = arith.constant 0 : index
    %c0_7 = arith.constant 0 : index
    %c0_8 = arith.constant 0 : index
    %15 = vector.load %arg4[%c0_6, %c0_7, %c0_8] : memref<1x10x4xf32, #tpu.memory_space<vmem>>, vector<1x10x4xf32>
    %16 = vector.shape_cast %15 : vector<1x10x4xf32> to vector<10x4xf32>
    %17 = vector.shape_cast %14 : vector<10x4xf32> to vector<1x10x4xf32>
    tpu.vector_store %arg4[%c0_6, %c0_7, %c0_8], %17 {strides = array<i32>} : memref<1x10x4xf32, #tpu.memory_space<vmem>>, vector<1x10x4xf32>,
    %cst_9 = arith.constant dense<0.000000e+00> : vector<4xf32>
    %18 = vector.multi_reduction <add>, %14, %cst_9 [0] : vector<10x4xf32> to vector<4xf32>
    %19 = vector.shape_cast %18 : vector<4xf32> to vector<1x4xf32>
    %20 = arith.mulf %14, %14 : vector<10x4xf32>
    %cst_10 = arith.constant dense<0.000000e+00> : vector<4xf32>
    %21 = vector.multi_reduction <add>, %20, %cst_10 [0] : vector<10x4xf32> to vector<4xf32>
    %22 = vector.shape_cast %21 : vector<4xf32> to vector<1x4xf32>
    %23 = tpu.concatenate %19, %22 in 0 : vector<1x4xf32>, vector<1x4xf32> -> vector<2x4xf32>
    %c0_11 = arith.constant 0 : index
    %c0_12 = arith.constant 0 : index
    %c0_13 = arith.constant 0 : index
    %24 = vector.load %arg5[%c0_11, %c0_12, %c0_13] : memref<1x2x4xf32, #tpu.memory_space<vmem>>, vector<1x2x4xf32>
    %25 = vector.shape_cast %24 : vector<1x2x4xf32> to vector<2x4xf32>
    %26 = vector.shape_cast %23 : vector<2x4xf32> to vector<1x2x4xf32>
    tpu.vector_store %arg5[%c0_11, %c0_12, %c0_13], %26 {strides = array<i32>} : memref<1x2x4xf32, #tpu.memory_space<vmem>>, vector<1x2x4xf32>,
    return
  }
  func.func @transform_0(%arg0: i32) -> (i32, i32, i32) {
    %c0_i32 = arith.constant 0 : i32
    %c0_i32_0 = arith.constant 0 : i32
    %c0_i32_1 = arith.constant 0 : i32
    return %arg0, %c0_i32, %c0_i32_0 : i32, i32, i32
  }
  func.func @transform_1(%arg0: i32) -> (i32, i32) {
    %c0_i32 = arith.constant 0 : i32
    %c0_i32_0 = arith.constant 0 : i32
    %c0_i32_1 = arith.constant 0 : i32
    return %c0_i32, %c0_i32_0 : i32, i32
  }
  func.func @transform_2(%arg0: i32) -> (i32, i32) {
    %c0_i32 = arith.constant 0 : i32
    %c0_i32_0 = arith.constant 0 : i32
    %c0_i32_1 = arith.constant 0 : i32
    return %c0_i32, %c0_i32_0 : i32, i32
  }
  func.func @transform_3(%arg0: i32) -> (i32, i32, i32) {
    %c0_i32 = arith.constant 0 : i32
    %c0_i32_0 = arith.constant 0 : i32
    %c0_i32_1 = arith.constant 0 : i32
    return %arg0, %c0_i32, %c0_i32_0 : i32, i32, i32
  }
  func.func @transform_4(%arg0: i32) -> (i32, i32, i32) {
    %c0_i32 = arith.constant 0 : i32
    %c0_i32_0 = arith.constant 0 : i32
    %c0_i32_1 = arith.constant 0 : i32
    return %arg0, %c0_i32, %c0_i32_0 : i32, i32, i32
  }
}

</mosaic_0001>

<bundles_post_ra>
// kernel: tpu_custom_call.1
= control target key start
LH: loop header
LB: loop body
LE: loop exit
PB: predicated region body
PF: predicated region fallthrough
CT: control target
= control target key end

     0   :  { %10 = vsyncpa [#allocation3], 0  ;;  %s744_s0 = inlined_call_operand.vmem [shape: f32[2,8,4], index: 0, kind: input, shape index: {}]   ;;  %s745_s1 = inlined_call_operand.vmem [shape: f32[12,4], index: 1, kind: input, shape index: {}]   ;;  %s746_s2 = inlined_call_operand.vmem [shape: f32[1,4], index: 2, kind: input, shape index: {}]   ;;  %s747_s3 = inlined_call_operand.vmem [shape: f32[2,10,4], index: 3, kind: output, shape index: {0}]   ;;  %s748_s4 = inlined_call_operand.hbm [shape: f32[2,2,4], index: 4, kind: output, shape index: {1}]  }
   0x1   :  { %12 = vsyncpa [#allocation3 + $0x1], 0  ;;  %s624_s15 = smov 0   ;;  %s626_s16 = smov 0  }
   0x2   :  { %s628_s17 = smov 0   ;;  %s630_s18 = smov 0  }
   0x3 LB: > { %s645_s19 = sadd.s32 4294967295, %s593_s18   ;;  %s455_s20 = sadd.s32 4294967294, %s593_s18   ;;  %s593_s18 = sphi %s630_s18, %s754_s18   ;;  %s589_s17 = sphi %s628_s17, %s753_s17   ;;  %s585_s16 = sphi %s626_s16, %s752_s16   ;;  %s581_s15 = sphi %s624_s15, %s751_s15  }
   0x4   : > { %s649_s21 = sadd.s32 1, %s593_s18   ;;  %s119_s22 = sadd.s32 1, %s589_s17 }
   0x5   : > { %s116_s23 = ssub.s32 %s593_s18, %s649_s21  ;;  %p129_p0 = scmp.ne.s32.totalorder %s589_s17, %s585_s16 }
   0x6   : > { %p117_p1 = scmp.eq.s32.totalorder %s116_s23, 0  ;;  %p130_p2 = scmp.eq.s32.totalorder %s645_s19, 1 }
   0x7   : > { %p135_p3 = scmp.ne.s32.totalorder %s585_s16, %s581_s15  ;;  %p136_p4 = scmp.eq.s32.totalorder %s455_s20, 1 }
   0x8   : > { %s660_s24 = scalar_select %p117_p1, %s589_s17, %s119_s22  }
   0x9   : > { %p662_p5 = por %p130_p2, %p129_p0  ;;  %p666_p6 = por %p136_p4, %p135_p3 }
   0xa   : > { %p458_p7 = scmp.ge.s32.totalorder %s593_s18, 1  ;;  %p167_p8 = scmp.lt.s32.totalorder %s593_s18, 3 }
   0xc   : > { %p168_p9 = pnand %p458_p7, %p167_p8 }
   0xd   : > { %p197_p10 = scmp.lt.s32.totalorder (!%p168_p9), %s645_s19, 1  ;;  %v229_v0 = vld [vmem:[%s745_s1] sm:$0xff] (!%p168_p9)  ;;  %v230_v1 = vld [vmem:[%s745_s1 + $0x8] sm:$0xf] (!%p168_p9)  ;;  %vm245_vm0 = vcmask (!%p168_p9), 1043456   ;;  %vm595_vm1 = vmmov (!%p168_p9), 1  }
   0xe   : > { %171 = sbr.rel (%p168_p9) target bundleno = 396 (0x18c), region = 32  ;;  %v483_v2 = vpack.c.bf16 (!%p168_p9), %v230_v1, %v229_v0  ;;  %vm484_vm2 = vmpackc.low (!%p168_p9), %vm245_vm0, %vm595_vm1  ;;  %s596_s10 = smov (!%p168_p9), 4   ;;  %vm223_vm3 = vcmask (!%p168_p9), 31744   ;;  %vm226_vm4 = vcmask (!%p168_p9), 64512   ;;  %vm238_vm5 = vcmask (!%p168_p9), 97280  }
   0xf   : > { %s597_s11 = smov (!%p168_p9), 8   ;;  %v463_v10 = vld [vmem:[%s746_s2] ss:$0 sm:$0xff] (!%p168_p9)  ;;  %vm325_vm6 = vcmask (!%p168_p9), 25600   ;;  %s194_s27 = sand.u32 (!%p168_p9), 1, %s585_s16   ;;  %vm214_vm7 = vcmask (!%p168_p9), 1040384  }
  0x10   : > { %485 = vmatprep.subr.msk.bf16.mxu0 (!%p168_p9), %vm484_vm2, %v483_v2  ;;  %s459_s28 = sshll.u32 (!%p168_p9), %s194_s27, 1  ;;  %s468_s29 = sshll.u32 (!%p168_p9), %s645_s19, 5 }
  0x11   : > { %488 = vmatpush3.bf16.msk.msra.mxu0 (!%p168_p9), %vm484_vm2, %v483_v2  ;;  %s196_s30 = scalar_lea.vmem (!%p168_p9), [#allocation2], %s459_s28  ;;  %s701_s8 = scalar_lea.hbm (!%p168_p9), %s748_s4, %s468_s29 }
  0x15   : > { %s198_s5 = scalar_select %p197_p10, %s645_s19, 1 }
  0x17   : > { %s460_s6 = sshll.u32 %s198_s5, 3  ;;  %s471_s12 = sshll.u32 %s198_s5, 4 }
  0x18   : > { %s200_s9 = scalar_lea.vmem %s744_s0, %s460_s6  ;;  %s205_s23 = scalar_lea.vmem %s747_s3, %s471_s12 }
  0x19   : > { %v206_v3 = vld [vmem:[%s200_s9] sm:$0xff]  ;;  %s371_s5 = sshll.u32 %s196_s30, 4  ;;  %s355_s9 = scalar_lea.sflag [#allocation3], %s194_s27  ;;  %s703_s5 = int_to_ptr.vmem [resolvable:$true] %s371_s5 }
  0x1a   : > { %v212_v4 = vrot.slane %v206_v3, 7  ;;  %v208_v5 = vrot.slane %v206_v3, 6  ;;  %s531_s19 = scalar_lea.vmem %s703_s5, 32 }
  0x1b   : > { %p532_p11 = scmp.ne.s32.totalorder %s703_s5, %s531_s19 }
  0x1c   : > { %217 = vrot.lane.b32.xlu0 %v212_v4, %s596_s10  ;;  %s598_s10 = smov [#allocation2]  }
  0x1d   : > { %p533_p12 = pnand %p532_p11, %p662_p5 }
  0x1f   : > { %p534_p13 = pneg %p533_p12 }
  0x20   : > { %220 = vrot.lane.b32.xlu0 %v206_v3, %s597_s11  ;;  %s535_s11 = sshll.u32 %s598_s10, 4  ;;  %s536_s11 = int_to_ptr.vmem [resolvable:$false] %s535_s11 }
  0x21   : > { %s537_s12 = scalar_lea.vmem %s536_s11, 64  ;;  %p538_p0 = scmp.lt.s32.totalorder %s703_s5, %s536_s11 }
  0x22   : > { %p539_p1 = scmp.lt.s32.totalorder %s537_s12, %s531_s19 }
  0x24   : > { %p540_p2 = por %p539_p1, %p538_p0 }
  0x26   : > { %p541_p3 = pnand %p540_p2, %p534_p13 }
  0x8e   : > { %v218_v6 = vpop.permute.xlu0 %217 }
  0x8f   : > { %v224_v7 = vsel %vm223_vm3, %v208_v5, %v218_v6 }
  0x92   : > { %v221_v8 = vpop.permute.xlu0 %220 }
  0x93   : > { %v227_v9 = vsel %vm226_vm4, %v224_v7, %v221_v8 }
  0x94   : > { %480 = vmatprep.mubr.msk.f32.mxu0 %vm238_vm5, %v227_v9 }
  0x95   : > { %481 = vmatmul.mubr.msk.f32.vlgmr.msra.gmra.mrb[0].mxu0 %vm238_vm5, %v227_v9 }
 0x168   : > { %v482_v11 = vpop.f32.mrb[0].mxu0 }
 0x169   : > { %v321_v12 = vadd.f32 %v482_v11, %v463_v10  ;;  %v315_v13 = vpop.f32.mrb[1].mxu0 }
 0x16a   : > { %v316_v14 = vadd.f32 %v463_v10, %v315_v13 }
 0x16b   : > { %326 = vst.msk [vmem:[%s205_s23 + $0x8] sm:$0x3] %vm325_vm6, %v321_v12  ;;  %v328_v15 = vsel %vm325_vm6, %v321_v12, 0.0  ;;  %v337_v16 = vmul.f32 %v321_v12, %v321_v12 }
 0x16c   : > { %324 = vst.msk [vmem:[%s205_s23] sm:$0xff] %vm223_vm3, %v316_v14  ;;  %v327_v17 = vsel %vm223_vm3, %v316_v14, 0.0  ;;  %v336_v18 = vmul.f32 %v316_v14, %v316_v14 }
 0x16d   : > { %v339_v19 = vsel %vm325_vm6, %v337_v16, 0.0  ;;  %v329_v20 = vadd.f32 %v328_v15, %v327_v17 }
 0x16e   : > { %v338_v21 = vsel %vm223_vm3, %v336_v18, 0.0 }
 0x16f   : > { %v330_v22 = vrot.slane %v329_v20, 4  ;;  %v340_v23 = vadd.f32 %v339_v19, %v338_v21 }
 0x171   : > { %v331_v24 = vadd.f32 %v330_v22, %v329_v20  ;;  %v341_v25 = vrot.slane %v340_v23, 4 }
 0x173   : > { %v332_v26 = vrot.slane %v331_v24, 2  ;;  %v342_v27 = vadd.f32 %v341_v25, %v340_v23 }
 0x175   : > { %v333_v28 = vadd.f32 %v332_v26, %v331_v24  ;;  %v343_v29 = vrot.slane %v342_v27, 2 }
 0x177   : > { %v334_v30 = vrot.slane %v333_v28, 1  ;;  %v344_v31 = vadd.f32 %v343_v29, %v342_v27 }
 0x179   : > { %v345_v32 = vrot.slane %v344_v31, 1  ;;  %v335_v33 = vadd.f32 %v334_v30, %v333_v28 }
 0x17b   : > { %v346_v34 = vadd.f32 %v345_v32, %v344_v31 }
 0x17d   : > { %v347_v35 = vsel %vm214_vm7, %v335_v33, %v346_v34 }
 0x17e   : > { %348 = vst.msk [vmem:[%s196_s30] sm:$0x3] %vm325_vm6, %v347_v35 }
 0x17f   : > { %544 = shalt.err (!%p541_p3)
}
 0x180   : > { %s545_s13 = scalar_lea.hbm %s701_s8, 32  ;;  %s549_s22 = scalar_lea.hbm %s748_s4, 64 }
 0x181   : > { %p546_p4 = scmp.ne.s32.totalorder %s701_s8, %s545_s13  ;;  %p550_p9 = scmp.lt.u32.totalorder %s701_s8, %s748_s4 }
 0x182   : > { %p551_p10 = scmp.lt.u32.totalorder %s549_s22, %s545_s13  ;;  %p553_p12 = scmp.lt.u32.totalorder %s545_s13, %s701_s8 }
 0x183   : > { %p547_p7 = pnand %p546_p4, %p662_p5 }
 0x184   : > { %p552_p11 = por %p551_p10, %p550_p9 }
 0x185   : > { %p548_p8 = pneg %p547_p7 }
 0x186   : > { %p554_p13 = por %p553_p12, %p552_p11 }
 0x188   : > { %p555_p0 = pnand %p554_p13, %p548_p8 }
 0x18a   : > { %558 = shalt.err (!%p555_p0)
}
 0x18b   : > { %489 = dma.vmem_to_hbm [thread:$0]  (%p662_p5), %s703_s5, 32, %s701_s8, %s355_s9  }
 0x18c PF: > { %p495_p1 = scmp.ge.s32.totalorder %s593_s18, 2  ;;  %s391_s28 = sand.u32 1, %s581_s15  }
 0x18d   : > { %s392_s29 = scalar_lea.sflag [#allocation3], %s391_s28 }
 0x18e   : > { %p492_p2 = pnand %p495_p1, %p666_p6 }
 0x190   : > { %576 = dma.done.wait (!%p492_p2), %s392_s29, 32  }
 0x191   : > { %578 = vsyncadd (!%p492_p2), %s392_s29, 4294967264  ;;  %p15_p3 = scmp.ge.s32.totalorder %s649_s21, 4   ;;  %s751_s15 = smov %s585_s16 }
 0x192   : > { %s752_s16 = smov %s589_s17  ;;  %s753_s17 = smov %s660_s24 }
 0x193   : > { %s754_s18 = smov %s649_s21  ;;  %17 = sbr.rel (!%p15_p3) target bundleno = 3 (0x3), region = 79 }
 0x19a   :  { %397 = vsyncpa [#allocation3], 1 }
 0x19b   :  { %399 = vsyncpa [#allocation3 + $0x1], 1 }

</bundles_post_ra>
